<compile_context>
chip_gen: v6e
topology: v6e:2x2x1
jax: 0.10.0
libtpu: 0.0.40
codegen_flags: <defaults>
</compile_context>

<pallas_src>
import functools

import jax
import jax.numpy as jnp
from jax.experimental import pallas as pl
from jax.experimental.pallas import tpu as pltpu

NEG_INF = -1e30
LANE = 128


def _round_up(n, m):
    return ((n + m - 1) // m) * m


def _pick_tile(n, cap):
    t = LANE
    while t * 2 <= cap and n % (t * 2) == 0:
        t *= 2
    return t


def _pad2d(a, rows, cols):
    out = jnp.zeros((rows, cols), a.dtype)
    return out.at[: a.shape[0], : a.shape[1]].set(a)


# --------------------------------------------------------------------- projection
def _proj_kernel(x_ref, w_ref, o_ref):
    # bf16 operands on the MXU, f32 accumulation.
    o_ref[...] = jnp.dot(
        x_ref[...].astype(jnp.bfloat16),
        w_ref[...].astype(jnp.bfloat16),
        preferred_element_type=jnp.float32,
    )


def _project(x, w_aug, *, tm):
    n, f = x.shape
    h = w_aug.shape[1]
    return pl.pallas_call(
        _proj_kernel,
        grid=(n // tm,),
        in_specs=[
            pl.BlockSpec((tm, f), lambda i: (i, 0)),
            pl.BlockSpec((f, h), lambda i: (0, 0)),
        ],
        out_specs=pl.BlockSpec((tm, h), lambda i: (i, 0)),
        out_shape=jax.ShapeDtypeStruct((n, h), jnp.float32),
        compiler_params=pltpu.CompilerParams(dimension_semantics=("parallel",)),
    )(x, w_aug)


# ------------------------------------------------------- masked attention (one layer)
def _attn_kernel(d_ref, s_ref, h_ref, adj_ref, b_ref, o_ref,
                 m_scr, l_scr, acc_scr, *, out_transform):
    k = pl.program_id(1)

    @pl.when(k == 0)
    def _():
        m_scr[...] = jnp.full_like(m_scr, NEG_INF)
        l_scr[...] = jnp.zeros_like(l_scr)
        acc_scr[...] = jnp.zeros_like(acc_scr)

    # adj is streamed as int8; build the edge mask once per tile and reuse it.
    mask = adj_ref[...].astype(jnp.float32) > 0.0                 # [tm, tk]

    # e[i, j] = LeakyReLU(d_i + s_j): d is a sublane column, s a lane row -> pure
    # VPU broadcast, no in-loop transpose.
    e = d_ref[...] + s_ref[...]                                   # [tm, tk]
    e = jnp.where(e > 0, e, 0.2 * e)                              # LeakyReLU(0.2)
    e = jnp.where(mask, e, NEG_INF)

    m_prev = m_scr[...]
    m_new = jnp.maximum(m_prev, jnp.max(e, axis=1, keepdims=True))
    corr = jnp.exp(m_prev - m_new)
    p = jnp.where(mask, jnp.exp(e - m_new), 0.0)                  # f32 softmax math

    l_scr[...] = corr * l_scr[...] + jnp.sum(p, axis=1, keepdims=True)
    acc_scr[...] = corr * acc_scr[...] + jnp.dot(
        p.astype(jnp.bfloat16),
        h_ref[...].astype(jnp.bfloat16),
        preferred_element_type=jnp.float32,
    )
    m_scr[...] = m_new

    @pl.when(k == pl.num_programs(1) - 1)
    def _():
        out = acc_scr[...] * pl.reciprocal(l_scr[...], approx=True) + b_ref[...]
        o_ref[...] = out_transform(out)


def _gat_attention(d_col, s_row, h_aug, adj, bias, out_transform, *, tm, tk):
    n, hp = h_aug.shape
    kernel = functools.partial(_attn_kernel, out_transform=out_transform)
    return pl.pallas_call(
        kernel,
        grid=(n // tm, n // tk),
        in_specs=[
            pl.BlockSpec((tm, 1), lambda i, k: (i, 0)),     # dst scores  [N, 1]
            pl.BlockSpec((1, tk), lambda i, k: (0, k)),     # src scores  [1, N] (lane vec)
            pl.BlockSpec((tk, hp), lambda i, k: (k, 0)),    # projected src features
            pl.BlockSpec((tm, tk), lambda i, k: (i, k)),    # adjacency tile (int8)
            pl.BlockSpec((1, hp), lambda i, k: (0, 0)),     # bias
        ],
        out_specs=pl.BlockSpec((tm, hp), lambda i, k: (i, 0)),
        out_shape=jax.ShapeDtypeStruct((n, hp), jnp.float32),
        scratch_shapes=[
            pltpu.VMEM((tm, 1), jnp.float32),    # running max
            pltpu.VMEM((tm, 1), jnp.float32),    # running sum
            pltpu.VMEM((tm, hp), jnp.float32),   # running weighted sum
        ],
        compiler_params=pltpu.CompilerParams(
            dimension_semantics=("parallel", "arbitrary")),
    )(d_col, s_row, h_aug, adj, bias)


# ----------------------------------------------------------------- output transforms
def _relu(z):
    return jnp.maximum(z, 0.0)


def _masked_log_softmax(z, num_valid):
    # log_softmax over the first `num_valid` (real class) columns only.
    col = jax.lax.broadcasted_iota(jnp.int32, z.shape, 1)
    valid = col < num_valid
    zm = jnp.where(valid, z, NEG_INF)
    m = jnp.max(zm, axis=1, keepdims=True)
    p = jnp.where(valid, jnp.exp(zm - m), 0.0)
    lse = jnp.log(jnp.sum(p, axis=1, keepdims=True))
    return jnp.where(valid, z - m - lse, 0.0)


# --------------------------------------------------------------------------- forward
def gat_net_forward(x, adj, params):
    """adj[i, j] = 1 iff there is an edge j -> i (self-loops included)."""
    w1, as1, ad1, b1, w2, as2, ad2, b2 = params
    n, f = x.shape
    h = w1.shape[1]
    c = w2.shape[1]

    np_ = _round_up(n, LANE)
    fp = _round_up(f, LANE)
    hp = _round_up(h + 2, LANE)   # +2 columns carry the fused a_src / a_dst scores
    cp = _round_up(c + 2, LANE)

    tm = _pick_tile(np_, 256)     # dst-row tile ("parallel" axis)
    tk = _pick_tile(np_, 512)     # src-col tile (streamed reduction axis)

    # --- pad inputs to lane-dense layouts -----------------------------------------
    xp = _pad2d(x.astype(jnp.float32), np_, fp)

    adj_p = jnp.zeros((np_, np_), jnp.int8).at[:n, :n].set((adj > 0).astype(jnp.int8))
    # Keep the "every row has >= 1 neighbor" invariant: self-loops on padded rows so
    # their softmax denominator never vanishes (their outputs are sliced away anyway).
    row = jnp.arange(np_)
    pad_eye = ((row[:, None] == row[None, :]) & (row[:, None] >= n)).astype(jnp.int8)
    adj_p = adj_p + pad_eye

    # --- fuse the attention score vectors into the projection weights --------------
    def augment(w, a_s, a_d, rows_p, cols_p):
        w_aug = jnp.concatenate([w, w @ a_s.T, w @ a_d.T], axis=1)   # [F, H+2]
        return _pad2d(w_aug, rows_p, cols_p)

    w1_aug = augment(w1, as1, ad1, fp, hp)
    w2_aug = augment(w2, as2, ad2, hp, cp)
    b1_p = _pad2d(b1.reshape(1, -1), 1, hp)
    b2_p = _pad2d(b2.reshape(1, -1), 1, cp)

    # --- layer 1: GATConv + ReLU ----------------------------------------------------
    h_aug1 = _project(xp, w1_aug, tm=tm)                 # [np_, hp]
    s1 = h_aug1[:, h:h + 1].T                            # [1, np_]  (layout plumbing)
    d1 = h_aug1[:, h + 1:h + 2]                          # [np_, 1]
    x1 = _gat_attention(d1, s1, h_aug1, adj_p, b1_p, _relu, tm=tm, tk=tk)

    # F.dropout(x, training=self.training) is the identity at inference time.
    # TODO(synk): feature / attention-coefficient dropout for training mode is not
    #             implemented.

    # --- layer 2: GATConv + log_softmax ---------------------------------------------
    h_aug2 = _project(x1, w2_aug, tm=tm)                 # [np_, cp]
    s2 = h_aug2[:, c:c + 1].T
    d2 = h_aug2[:, c + 1:c + 2]
    log_softmax_c = functools.partial(_masked_log_softmax, num_valid=c)
    z = _gat_attention(d2, s2, h_aug2, adj_p, b2_p, log_softmax_c, tm=tm, tk=tk)

    return z[:n, :c]


# ------------------------------------------------------------------------- reference
def ref_forward(x, adj, params):
    """Pure-JAX reference (dense PyG GAT math). Mirrors the kernel's bf16-at-the-MXU
    casting and delayed normalization so the numeric check stays tight; all other
    math is exact f32."""
    w1, as1, ad1, b1, w2, as2, ad2, b2 = params

    def layer(xin, w, a_s, a_d, b):
        xb = xin.astype(jnp.bfloat16)
        h = jnp.dot(xb, w.astype(jnp.bfloat16), preferred_element_type=jnp.float32)
        s = jnp.dot(xb, (w @ a_s.T).astype(jnp.bfloat16),
                    preferred_element_type=jnp.float32)            # [N, 1] source score
        d = jnp.dot(xb, (w @ a_d.T).astype(jnp.bfloat16),
                    preferred_element_type=jnp.float32)            # [N, 1] target score
        e = d + s.T                                                # e[i, j] = d_i + s_j
        e = jnp.where(e > 0, e, 0.2 * e)                           # LeakyReLU(0.2)
        e = jnp.where(adj > 0, e, NEG_INF)
        e = e - jnp.max(e, axis=1, keepdims=True)
        p = jnp.where(adj > 0, jnp.exp(e), 0.0)
        num = jnp.dot(p.astype(jnp.bfloat16), h.astype(jnp.bfloat16),
                      preferred_element_type=jnp.float32)
        return num / jnp.sum(p, axis=1, keepdims=True) + b

    h1 = jnp.maximum(layer(x, w1, as1, ad1, b1), 0.0)
    z = layer(h1, w2, as2, ad2, b2)
    return jax.nn.log_softmax(z, axis=1)


if __name__ == "__main__":
    # Small synthetic graph consistent with GAT_Net(features, hidden, classes, heads=1).
    N, F_IN, HID, CLS, E = 32, 16, 32, 8, 96

    key = jax.random.PRNGKey(0)
    ks = jax.random.split(key, 10)

    x = jax.random.normal(ks[0], (N, F_IN), jnp.float32)
    src = jax.random.randint(ks[1], (E,), 0, N)
    dst = jax.random.randint(ks[2], (E,), 0, N)
    edge_index = jnp.stack([src, dst])                       # [2, E] like PyG

    # Dense adjacency mask: adj[i, j] = 1 if edge j -> i (plus self loops).
    adj = jnp.zeros((N, N), jnp.float32)
    adj = adj.at[edge_index[1], edge_index[0]].set(1.0)
    adj = adj.at[jnp.arange(N), jnp.arange(N)].set(1.0)      # add_self_loops=True

    def glorot(k, shape):
        lim = (6.0 / (shape[0] + shape[1])) ** 0.5
        return jax.random.uniform(k, shape, jnp.float32, -lim, lim)

    # GATConv(F_IN, HID, heads=1): W [F_IN, HID], att_src/att_dst [1, HID], bias [HID]
    w1 = glorot(ks[3], (F_IN, HID))
    as1 = glorot(ks[4], (1, HID))
    ad1 = glorot(ks[5], (1, HID))
    b1 = jnp.zeros((1, HID), jnp.float32)
    # GATConv(HID, CLS): W [HID, CLS], att_src/att_dst [1, CLS], bias [CLS]
    w2 = glorot(ks[6], (HID, CLS))
    as2 = glorot(ks[7], (1, CLS))
    ad2 = glorot(ks[8], (1, CLS))
    b2 = jnp.zeros((1, CLS), jnp.float32)

    params = (w1, as1, ad1, b1, w2, as2, ad2, b2)

    out = jax.block_until_ready(gat_net_forward(x, adj, params))
    ref = jax.block_until_ready(ref_forward(x, adj, params))

    assert out.shape == (N, CLS)
    # Tolerance accounts for bf16 MXU operands and the approx EUP reciprocal.
    assert jnp.allclose(out, ref, atol=3e-2, rtol=3e-2), (
        f"Pallas kernel mismatch vs reference, max abs diff "
        f"{jnp.max(jnp.abs(out - ref))}")

    print("KERNEL_OK")
</pallas_src>

<mosaic_0001>
module attributes {stable_mosaic.version = 11 : i64} {
  func.func @_proj_kernel(%arg0: i32, %arg1: memref<128x128xf32, #tpu.memory_space<vmem>>, %arg2: memref<128x128xf32, #tpu.memory_space<vmem>>, %arg3: memref<128x128xf32, #tpu.memory_space<vmem>>) attributes {dimension_semantics = [#tpu.dimension_semantics<parallel>], iteration_bounds = array<i64: 1>, scalar_prefetch = 0 : i64, scratch_operands = 0 : i64, tpu.core_type = #tpu.core_type<tc>, window_params = [{transform_indices = @transform_0, window_bounds = array<i64: 128, 128>}, {pipeline_mode = #tpu.pipeline_mode<synchronous>, transform_indices = @transform_1, window_bounds = array<i64: 128, 128>}, {transform_indices = @transform_2, window_bounds = array<i64: 128, 128>}]} {
    %c0 = arith.constant 0 : index
    %c0_0 = arith.constant 0 : index
    %0 = vector.load %arg1[%c0, %c0_0] : memref<128x128xf32, #tpu.memory_space<vmem>>, vector<128x128xf32>
    %1 = arith.truncf %0 : vector<128x128xf32> to vector<128x128xbf16>
    %c0_1 = arith.constant 0 : index
    %c0_2 = arith.constant 0 : index
    %2 = vector.load %arg2[%c0_1, %c0_2] : memref<128x128xf32, #tpu.memory_space<vmem>>, vector<128x128xf32>
    %3 = arith.truncf %2 : vector<128x128xf32> to vector<128x128xbf16>
    %cst = arith.constant dense<0.000000e+00> : vector<128x128xf32>
    %4 = tpu.matmul %1, %3, %cst {dimension_numbers = #tpu.dot_dimension_numbers<[1], [0], [0], [1], [0, 0, 1, 1], [], []>} : vector<128x128xbf16>, vector<128x128xbf16>, vector<128x128xf32> -> vector<128x128xf32>
    %c0_3 = arith.constant 0 : index
    %c0_4 = arith.constant 0 : index
    %5 = vector.load %arg3[%c0_3, %c0_4] : memref<128x128xf32, #tpu.memory_space<vmem>>, vector<128x128xf32>
    tpu.vector_store %arg3[%c0_3, %c0_4], %4 {strides = array<i32>} : memref<128x128xf32, #tpu.memory_space<vmem>>, vector<128x128xf32>,
    return
  }
  func.func @transform_0(%arg0: i32) -> (i32, i32) {
    %c0_i32 = arith.constant 0 : i32
    %c0_i32_0 = arith.constant 0 : i32
    return %arg0, %c0_i32 : i32, i32
  }
  func.func @transform_1(%arg0: i32) -> (i32, i32) {
    %c0_i32 = arith.constant 0 : i32
    %c0_i32_0 = arith.constant 0 : i32
    %c0_i32_1 = arith.constant 0 : i32
    return %c0_i32, %c0_i32_0 : i32, i32
  }
  func.func @transform_2(%arg0: i32) -> (i32, i32) {
    %c0_i32 = arith.constant 0 : i32
    %c0_i32_0 = arith.constant 0 : i32
    return %arg0, %c0_i32 : i32, i32
  }
}

</mosaic_0001>

<bundles_post_ra>
// kernel: tpu_custom_call.1
= control target key start
LH: loop header
LB: loop body
LE: loop exit
PB: predicated region body
PF: predicated region fallthrough
CT: control target
= control target key end

     0   :  { %7 = vsyncpa [#allocation3], 0  ;;  %s393_s0 = inlined_call_operand.hbm [shape: f32[128,128], index: 0, kind: input, shape index: {}]   ;;  %s394_s1 = inlined_call_operand.hbm [shape: f32[128,128], index: 1, kind: input, shape index: {}]   ;;  %s395_s2 = inlined_call_operand.hbm [shape: f32[128,128], index: 2, kind: output, shape index: {}]  }
   0x1   :  { %8 = vsyncpa [#allocation6], 0 }
   0x2   :  { %9 = vsyncpa [#allocation4], 0  ;;  %s355_s9 = smov [#allocation2]  }
   0x3   :  { %s15_s10 = sshll.u32 %s355_s9, 4  ;;  %s16_s10 = int_to_ptr.vmem [resolvable:$true] %s15_s10 }
   0x4   :  { %s297_s11 = scalar_lea.vmem %s16_s10, 2048  ;;  %p302_p1 = scmp.lt.s32.totalorder %s16_s10, %s16_s10 }
   0x5   :  { %p298_p0 = scmp.ne.s32.totalorder %s16_s10, %s297_s11  ;;  %p303_p2 = scmp.lt.s32.totalorder %s297_s11, %s297_s11 }
   0x7   :  { %p304_p3 = por %p303_p2, %p302_p1 }
   0x9   :  { %p305_p4 = pnand %p304_p3, %p298_p0 }
   0xb   :  { %308 = shalt.err (!%p305_p4)
}
   0xc   :  { %s356_s12 = smov 128   ;;  %s357_s13 = smov 8  }
   0xd   :  { %21 = dma.hbm_to_vmem [thread:$0]  %s393_s0, 2048, %s16_s10, [#allocation3], %s356_s12, %s356_s12, %s357_s13  }
   0xe   :  { %s358_s16 = smov [#allocation5]  }
   0xf   :  { %s27_s17 = sshll.u32 %s358_s16, 4  ;;  %s28_s17 = int_to_ptr.vmem [resolvable:$true] %s27_s17 }
  0x10   :  { %s317_s18 = scalar_lea.vmem %s28_s17, 2048  ;;  %p322_p6 = scmp.lt.s32.totalorder %s28_s17, %s28_s17 }
  0x11   :  { %p318_p5 = scmp.ne.s32.totalorder %s28_s17, %s317_s18  ;;  %p323_p7 = scmp.lt.s32.totalorder %s317_s18, %s317_s18 }
  0x13   :  { %p324_p8 = por %p323_p7, %p322_p6 }
  0x15   :  { %p325_p9 = pnand %p324_p8, %p318_p5 }
  0x17   :  { %328 = shalt.err (!%p325_p9)
}
  0x18   :  { %33 = dma.hbm_to_vmem [thread:$0]  %s394_s1, 2048, %s28_s17, [#allocation6], %s356_s12, %s356_s12, %s357_s13  }
  0x19   :  { %349 = dma.done.wait [#allocation3], 2048  }
  0x1a   :  { %350 = vsyncadd [#allocation3], 4294965248 }
  0x1b   :  { %351 = dma.done.wait [#allocation6], 2048  }
  0x1c   :  { %352 = vsyncadd [#allocation6], 4294965248  ;;  %v79_v0 = vld [vmem:[#allocation5 + $0x70] sm:$0xff]  ;;  %v80_v1 = vld [vmem:[#allocation5 + $0x78] sm:$0xff]  ;;  %s359_s0 = smov [#allocation7]  }
  0x1d   :  { %v77_v2 = vld [vmem:[#allocation5 + $0x60] sm:$0xff]  ;;  %v88_v3 = vpack.c.bf16 %v80_v1, %v79_v0  ;;  %v78_v4 = vld [vmem:[#allocation5 + $0x68] sm:$0xff]  ;;  %v75_v6 = vld [vmem:[#allocation5 + $0x50] sm:$0xff]  ;;  %s207_s1 = sshll.u32 %s359_s0, 4  ;;  %s208_s1 = int_to_ptr.vmem [resolvable:$true] %s207_s1 }
  0x1e   :  { %v87_v5 = vpack.c.bf16 %v78_v4, %v77_v2  ;;  %v76_v7 = vld [vmem:[#allocation5 + $0x58] sm:$0xff]  ;;  %v73_v9 = vld [vmem:[#allocation5 + $0x40] sm:$0xff]  ;;  %v42_v11 = vld [vmem:[#allocation2 + $0x8] sm:$0xff]  ;;  %s329_s21 = scalar_lea.vmem %s208_s1, 2048  ;;  %p334_p11 = scmp.lt.s32.totalorder %s208_s1, %s208_s1 }
  0x1f   :  { %236 = vmatprep.subr.bf16.mxu0 %v88_v3  ;;  %268 = vmatprep.subr.bf16.mxu1 %v88_v3  ;;  %v86_v8 = vpack.c.bf16 %v76_v7, %v75_v6  ;;  %v41_v10 = vld [vmem:[#allocation2] sm:$0xff]  ;;  %v74_v12 = vld [vmem:[#allocation5 + $0x48] sm:$0xff]  ;;  %v71_v18 = vld [vmem:[#allocation5 + $0x30] sm:$0xff]  ;;  %p330_p10 = scmp.ne.s32.totalorder %s208_s1, %s329_s21  ;;  %p335_p12 = scmp.lt.s32.totalorder %s329_s21, %s329_s21 }
  0x20   :  { %237 = vmatpush3.bf16.msra.mxu0 %v88_v3  ;;  %276 = vmatpush3.bf16.msra.mxu1 %v88_v3  ;;  %v57_v13 = vpack.c.bf16 %v42_v11, %v41_v10  ;;  %v49_v14 = vld [vmem:[#allocation2 + $0x40] sm:$0xff]  ;;  %v50_v15 = vld [vmem:[#allocation2 + $0x48] sm:$0xff]  ;;  %v85_v17 = vpack.c.bf16 %v74_v12, %v73_v9  ;;  %v72_v19 = vld [vmem:[#allocation5 + $0x38] sm:$0xff] }
  0x21   :  { %238 = vmatprep.subr.bf16.mxu0 %v87_v5  ;;  %269 = vmatprep.subr.bf16.mxu1 %v87_v5  ;;  %v61_v16 = vpack.c.bf16 %v50_v15, %v49_v14  ;;  %v84_v20 = vpack.c.bf16 %v72_v19, %v71_v18  ;;  %v69_v21 = vld [vmem:[#allocation5 + $0x20] sm:$0xff]  ;;  %v70_v22 = vld [vmem:[#allocation5 + $0x28] sm:$0xff]  ;;  %v67_v24 = vld [vmem:[#allocation5 + $0x10] sm:$0xff]  ;;  %p336_p13 = por %p335_p12, %p334_p11 }
  0x22   :  { %252 = vmatprep.mubr.bf16.mxu0 %v57_v13  ;;  %v83_v23 = vpack.c.bf16 %v70_v22, %v69_v21  ;;  %v68_v25 = vld [vmem:[#allocation5 + $0x18] sm:$0xff]  ;;  %v65_v27 = vld [vmem:[#allocation5] sm:$0xff]  ;;  %v66_v28 = vld [vmem:[#allocation5 + $0x8] sm:$0xff] }
  0x23   :  { %260 = vmatprep.mubr.bf16.mxu1 %v61_v16  ;;  %v82_v26 = vpack.c.bf16 %v68_v25, %v67_v24  ;;  %v81_v29 = vpack.c.bf16 %v66_v28, %v65_v27  ;;  %v43_v30 = vld [vmem:[#allocation2 + $0x10] sm:$0xff]  ;;  %v44_v31 = vld [vmem:[#allocation2 + $0x18] sm:$0xff]  ;;  %v45_v34 = vld [vmem:[#allocation2 + $0x20] sm:$0xff]  ;;  %p337_p0 = pnand %p336_p13, %p330_p10 }
  0x24   :  { %239 = vmatpush3.bf16.msra.mxu0 %v87_v5  ;;  %277 = vmatpush3.bf16.msra.mxu1 %v87_v5  ;;  %v51_v32 = vld [vmem:[#allocation2 + $0x50] sm:$0xff]  ;;  %v52_v33 = vld [vmem:[#allocation2 + $0x58] sm:$0xff]  ;;  %v46_v35 = vld [vmem:[#allocation2 + $0x28] sm:$0xff]  ;;  %v58_v38 = vpack.c.bf16 %v44_v31, %v43_v30 }
  0x25   :  { %240 = vmatprep.subr.bf16.mxu0 %v86_v8  ;;  %270 = vmatprep.subr.bf16.mxu1 %v86_v8  ;;  %v53_v36 = vld [vmem:[#allocation2 + $0x60] sm:$0xff]  ;;  %v54_v37 = vld [vmem:[#allocation2 + $0x68] sm:$0xff]  ;;  %v62_v39 = vpack.c.bf16 %v52_v33, %v51_v32  ;;  %v59_v40 = vpack.c.bf16 %v46_v35, %v45_v34  ;;  %v47_v42 = vld [vmem:[#allocation2 + $0x30] sm:$0xff] }
  0x26   :  { %v63_v41 = vpack.c.bf16 %v54_v37, %v53_v36  ;;  %v48_v43 = vld [vmem:[#allocation2 + $0x38] sm:$0xff]  ;;  %v55_v44 = vld [vmem:[#allocation2 + $0x70] sm:$0xff] }
  0x27   :  { %v56_v45 = vld [vmem:[#allocation2 + $0x78] sm:$0xff]  ;;  %v60_v46 = vpack.c.bf16 %v48_v43, %v47_v42 }
  0x28   :  { %241 = vmatpush3.bf16.msra.mxu0 %v86_v8  ;;  %278 = vmatpush3.bf16.msra.mxu1 %v86_v8  ;;  %v64_v47 = vpack.c.bf16 %v56_v45, %v55_v44 }
  0x29   :  { %242 = vmatprep.subr.bf16.mxu0 %v85_v17  ;;  %271 = vmatprep.subr.bf16.mxu1 %v85_v17 }
  0x2c   :  { %243 = vmatpush3.bf16.msra.mxu0 %v85_v17  ;;  %279 = vmatpush3.bf16.msra.mxu1 %v85_v17 }
  0x2d   :  { %244 = vmatprep.subr.bf16.mxu0 %v84_v20  ;;  %272 = vmatprep.subr.bf16.mxu1 %v84_v20 }
  0x30   :  { %245 = vmatpush3.bf16.msra.mxu0 %v84_v20  ;;  %280 = vmatpush3.bf16.msra.mxu1 %v84_v20 }
  0x31   :  { %246 = vmatprep.subr.bf16.mxu0 %v83_v23  ;;  %273 = vmatprep.subr.bf16.mxu1 %v83_v23 }
  0x34   :  { %247 = vmatpush3.bf16.msra.mxu0 %v83_v23  ;;  %281 = vmatpush3.bf16.msra.mxu1 %v83_v23 }
  0x35   :  { %248 = vmatprep.subr.bf16.mxu0 %v82_v26  ;;  %274 = vmatprep.subr.bf16.mxu1 %v82_v26 }
  0x38   :  { %249 = vmatpush3.bf16.msra.mxu0 %v82_v26  ;;  %282 = vmatpush3.bf16.msra.mxu1 %v82_v26 }
  0x39   :  { %250 = vmatprep.subr.bf16.mxu0 %v81_v29  ;;  %275 = vmatprep.subr.bf16.mxu1 %v81_v29 }
  0x3c   :  { %251 = vmatpush3.bf16.msra.mxu0 %v81_v29  ;;  %283 = vmatpush3.bf16.msra.mxu1 %v81_v29 }
  0x3f   :  { %253 = vmatmul.mubr.bf16.vlgmr.msra.gmra.mxu0 %v58_v38  ;;  %261 = vmatmul.mubr.bf16.vlgmr.msra.gmra.mxu1 %v62_v39 }
  0x40   :  { %256 = vmatprep.mubr.bf16.mxu0 %v59_v40  ;;  %264 = vmatprep.mubr.bf16.mxu1 %v63_v41 }
  0x47   :  { %257 = vmatmul.mubr.bf16.gmra.mxu0 %v60_v46  ;;  %265 = vmatmul.mubr.bf16.gmra.mxu1 %v64_v47 }
  0xff   :  { %v254_v48 = vpop.f32.mrf.mxu0  ;;  %v262_v49 = vpop.f32.mrf.mxu1 }
 0x100   :  { %188 = vst [vmem:[#allocation7 + $0x10] sm:$0xff] %v254_v48  ;;  %196 = vst [vmem:[#allocation7 + $0x50] sm:$0xff] %v262_v49 }
 0x101   :  { %v123_v50 = vpop.f32.mrf.mxu0  ;;  %v155_v51 = vpop.f32.mrf.mxu1 }
 0x102   :  { %186 = vst [vmem:[#allocation7] sm:$0xff] %v123_v50  ;;  %194 = vst [vmem:[#allocation7 + $0x40] sm:$0xff] %v155_v51 }
 0x103   :  { %v255_v52 = vpop.f32.mrf.mxu0  ;;  %v263_v53 = vpop.f32.mrf.mxu1 }
 0x104   :  { %189 = vst [vmem:[#allocation7 + $0x18] sm:$0xff] %v255_v52  ;;  %197 = vst [vmem:[#allocation7 + $0x58] sm:$0xff] %v263_v53 }
 0x105   :  { %v126_v54 = vpop.f32.mrf.mxu0  ;;  %v158_v55 = vpop.f32.mrf.mxu1 }
 0x106   :  { %187 = vst [vmem:[#allocation7 + $0x8] sm:$0xff] %v126_v54  ;;  %195 = vst [vmem:[#allocation7 + $0x48] sm:$0xff] %v158_v55 }
 0x107   :  { %v258_v56 = vpop.f32.mrf.mxu0  ;;  %v266_v57 = vpop.f32.mrf.mxu1 }
 0x108   :  { %192 = vst [vmem:[#allocation7 + $0x30] sm:$0xff] %v258_v56  ;;  %200 = vst [vmem:[#allocation7 + $0x70] sm:$0xff] %v266_v57 }
 0x109   :  { %v139_v58 = vpop.f32.mrf.mxu0  ;;  %v171_v59 = vpop.f32.mrf.mxu1 }
 0x10a   :  { %190 = vst [vmem:[#allocation7 + $0x20] sm:$0xff] %v139_v58  ;;  %198 = vst [vmem:[#allocation7 + $0x60] sm:$0xff] %v171_v59 }
 0x10b   :  { %v259_v60 = vpop.f32.mrf.mxu0  ;;  %v267_v61 = vpop.f32.mrf.mxu1 }
 0x10c   :  { %193 = vst [vmem:[#allocation7 + $0x38] sm:$0xff] %v259_v60  ;;  %201 = vst [vmem:[#allocation7 + $0x78] sm:$0xff] %v267_v61 }
 0x10d   :  { %v142_v62 = vpop.f32.mrf.mxu0  ;;  %v174_v63 = vpop.f32.mrf.mxu1 }
 0x10e   :  { %191 = vst [vmem:[#allocation7 + $0x28] sm:$0xff] %v142_v62  ;;  %199 = vst [vmem:[#allocation7 + $0x68] sm:$0xff] %v174_v63 }
 0x10f   :  { %340 = shalt.err (!%p337_p0)
}
 0x110   :  { %213 = dma.vmem_to_hbm [thread:$0]  %s208_s1, 2048, %s395_s2, [#allocation4], %s356_s12, %s356_s12, %s357_s13  }
 0x111   :  { %353 = dma.done.wait [#allocation4], 2048  }
 0x112   :  { %354 = vsyncadd [#allocation4], 4294965248 }
 0x113   :  { %217 = vsyncpa [#allocation3], 1 }
 0x114   :  { %218 = vsyncpa [#allocation6], 1 }
 0x115   :  { %219 = vsyncpa [#allocation4], 1 }

</bundles_post_ra>
